<compile_context>
chip_gen: v7x
topology: tpu7x:2x2x1
jax: 0.10.0
libtpu: 0.0.40
codegen_flags: <defaults>
</compile_context>

<pallas_src>
import jax
import jax.numpy as jnp
from jax.experimental import pallas as pl
from jax.experimental.pallas import tpu as pltpu


def ew_conv_kernel(a_ref, h_ref, w_ref, b_ref, o_ref):
    # a_ref: [M, M]  block-diagonal weighted adjacency (deg on the diagonal)
    # h_ref: [M, F_in]   w_ref: [F_in, F_out]   b_ref: [1, F_out]
    # o_ref: [M, F_out]
    # Aggregation (message + reduce) as one MXU matmul; f32 accumulate.
    agg = jnp.dot(a_ref[...], h_ref[...], preferred_element_type=jnp.float32)
    # Node apply: relu(agg @ W + b).  agg kept in f32 (K=F_in is tiny, the
    # MXU rate is irrelevant and it avoids re-rounding the aggregated sums).
    out = jnp.dot(agg, w_ref[...], preferred_element_type=jnp.float32)
    o_ref[...] = jnp.maximum(out + b_ref[...], 0.0)


def ew_conv(adj, h, w, b, *, rows_per_step=256):
    """adj: [B, N, N] f32 (deg folded into diagonal), h: [B, N, F_in] f32,
    w: [F_in, F_out] f32, b: [1, F_out] f32  ->  [B, N, F_out] f32."""
    B, N, _ = adj.shape
    f_in = h.shape[-1]
    f_out = w.shape[-1]

    # Largest group G dividing B such that G*N >= rows_per_step (capped at B).
    group = min(B, max(1, -(-rows_per_step // N)))
    while B % group:
        group -= 1
    ng = B // group
    M = group * N

    # Pack G graphs per grid step: block-diagonal adjacency + stacked features.
    a4 = adj.reshape(ng, group, N, N)
    eye = jnp.eye(group, dtype=adj.dtype)
    a_bd = jnp.einsum("xgij,gh->xgihj", a4, eye).reshape(ng, M, M)
    h_pk = h.reshape(ng, M, f_in)

    flops = ng * (2 * M * M * f_in + 2 * M * f_in * f_out)
    bytes_accessed = (ng * M * M * 4 + ng * M * f_in * 4
                      + f_in * f_out * 4 + f_out * 4 + ng * M * f_out * 4)

    out = pl.pallas_call(
        ew_conv_kernel,
        out_shape=jax.ShapeDtypeStruct((ng, M, f_out), jnp.float32),
        grid_spec=pltpu.PrefetchScalarGridSpec(
            num_scalar_prefetch=0,
            grid=(ng,),                                      # one packed group per step
            in_specs=[
                pl.BlockSpec((None, M, M), lambda g: (g, 0, 0)),      # A (block-diag)
                pl.BlockSpec((None, M, f_in), lambda g: (g, 0, 0)),   # H packed
                pl.BlockSpec((f_in, f_out), lambda g: (0, 0)),        # W (resident)
                pl.BlockSpec((1, f_out), lambda g: (0, 0)),           # b (resident)
            ],
            out_specs=pl.BlockSpec((None, M, f_out), lambda g: (g, 0, 0)),
        ),
        compiler_params=pltpu.CompilerParams(
            dimension_semantics=("parallel",)),
        cost_estimate=pl.CostEstimate(flops=flops, transcendentals=0,
                                      bytes_accessed=bytes_accessed),
    )(a_bd, h_pk, w, b)

    # Contiguous un-pack back to per-graph layout (pure reshape, no slice pass).
    return out.reshape(B, N, f_out)


def build_graph(n_nodes, src, dst, d):
    """Dense weighted adjacency with in-degree folded into the diagonal (f32):
       A[v,u] = sum_{edges u->v} (1 - d_e);  A[v,v] += in_degree(v)."""
    adj = jnp.zeros((n_nodes, n_nodes), jnp.float32)
    adj = adj.at[dst, src].add(1.0 - d)
    deg = jnp.zeros((n_nodes,), jnp.float32).at[dst].add(1.0)
    idx = jnp.arange(n_nodes)
    adj = adj.at[idx, idx].add(deg)
    return adj


def reference(adj, h, w, b):
    agg = jnp.einsum("bnm,bmf->bnf", adj, h,
                     precision=jax.lax.Precision.HIGHEST)
    out = jnp.einsum("bnf,fo->bno", agg, w,
                     precision=jax.lax.Precision.HIGHEST) + b
    return jnp.maximum(out, 0.0)


if __name__ == "__main__":
    key = jax.random.PRNGKey(0)
    k_h, k_d, k_w, k_b = jax.random.split(key, 4)

    B = 32          # graphs; packed 16-per-grid-step -> 256-row MXU matmuls
    N = 16          # nodes per graph
    in_feats = 16
    out_feats = 32

    # Deterministic small directed graph: node i sends to (i+1)%N and (i+3)%N.
    src = jnp.concatenate([jnp.arange(N), jnp.arange(N)]).astype(jnp.int32)
    dst = jnp.concatenate([(jnp.arange(N) + 1) % N,
                           (jnp.arange(N) + 3) % N]).astype(jnp.int32)
    E = src.shape[0]

    # feature[0]: node features; feature[1]: per-edge scalar 'd' (per graph).
    h = jax.random.normal(k_h, (B, N, in_feats), dtype=jnp.float32)
    d = jax.random.uniform(k_d, (B, E), dtype=jnp.float32)

    # nn.Linear(in, out): PyTorch computes x @ W.T + b; store W pre-transposed.
    w = jax.random.normal(k_w, (in_feats, out_feats), dtype=jnp.float32) * 0.1
    b = jax.random.normal(k_b, (1, out_feats), dtype=jnp.float32) * 0.1

    adj = jnp.stack([build_graph(N, src, dst, d[i]) for i in range(B)])  # [B,N,N]

    out = jax.block_until_ready(ew_conv(adj, h, w, b))
    ref = reference(adj, h, w, b)

    assert out.shape == (B, N, out_feats)
    assert jnp.allclose(out, ref, atol=1e-2, rtol=1e-2), float(
        jnp.max(jnp.abs(out - ref)))

    print("KERNEL_OK")
</pallas_src>

<mosaic_0001>
module attributes {stable_mosaic.version = 11 : i64} {
  func.func @ew_conv_kernel(%arg0: i32, %arg1: memref<1x256x256xf32, #tpu.memory_space<vmem>>, %arg2: memref<1x256x16xf32, #tpu.memory_space<vmem>>, %arg3: memref<16x32xf32, #tpu.memory_space<vmem>>, %arg4: memref<1x32xf32, #tpu.memory_space<vmem>>, %arg5: memref<1x256x32xf32, #tpu.memory_space<vmem>>) attributes {dimension_semantics = [#tpu.dimension_semantics<parallel>], iteration_bounds = array<i64: 2>, scalar_prefetch = 0 : i64, scratch_operands = 0 : i64, tpu.core_type = #tpu.core_type<tc>, window_params = [{transform_indices = @transform_0, window_bounds = array<i64: 1, 256, 256>}, {transform_indices = @transform_1, window_bounds = array<i64: 1, 256, 16>}, {pipeline_mode = #tpu.pipeline_mode<synchronous>, transform_indices = @transform_2, window_bounds = array<i64: 16, 32>}, {pipeline_mode = #tpu.pipeline_mode<synchronous>, transform_indices = @transform_3, window_bounds = array<i64: 1, 32>}, {transform_indices = @transform_4, window_bounds = array<i64: 1, 256, 32>}]} {
    %c0 = arith.constant 0 : index
    %c0_0 = arith.constant 0 : index
    %c0_1 = arith.constant 0 : index
    %0 = vector.load %arg1[%c0, %c0_0, %c0_1] : memref<1x256x256xf32, #tpu.memory_space<vmem>>, vector<1x256x256xf32>
    %1 = vector.shape_cast %0 : vector<1x256x256xf32> to vector<256x256xf32>
    %c0_2 = arith.constant 0 : index
    %c0_3 = arith.constant 0 : index
    %c0_4 = arith.constant 0 : index
    %2 = vector.load %arg2[%c0_2, %c0_3, %c0_4] : memref<1x256x16xf32, #tpu.memory_space<vmem>>, vector<1x256x16xf32>
    %3 = vector.shape_cast %2 : vector<1x256x16xf32> to vector<256x16xf32>
    %cst = arith.constant dense<0.000000e+00> : vector<256x16xf32>
    %4 = tpu.matmul %1, %3, %cst {dimension_numbers = #tpu.dot_dimension_numbers<[1], [0], [0], [1], [0, 0, 1, 1], [], []>} : vector<256x256xf32>, vector<256x16xf32>, vector<256x16xf32> -> vector<256x16xf32>
    %c0_5 = arith.constant 0 : index
    %c0_6 = arith.constant 0 : index
    %5 = vector.load %arg3[%c0_5, %c0_6] : memref<16x32xf32, #tpu.memory_space<vmem>>, vector<16x32xf32>
    %cst_7 = arith.constant dense<0.000000e+00> : vector<256x32xf32>
    %6 = tpu.matmul %4, %5, %cst_7 {dimension_numbers = #tpu.dot_dimension_numbers<[1], [0], [0], [1], [0, 0, 1, 1], [], []>} : vector<256x16xf32>, vector<16x32xf32>, vector<256x32xf32> -> vector<256x32xf32>
    %c0_8 = arith.constant 0 : index
    %c0_9 = arith.constant 0 : index
    %7 = vector.load %arg4[%c0_8, %c0_9] : memref<1x32xf32, #tpu.memory_space<vmem>>, vector<1x32xf32>
    %8 = vector.broadcast %7 : vector<1x32xf32> to vector<256x32xf32>
    %9 = arith.addf %6, %8 : vector<256x32xf32>
    %cst_10 = arith.constant 0.000000e+00 : f32
    %10 = vector.broadcast %cst_10 : f32 to vector<256x32xf32>
    %11 = arith.maximumf %9, %10 : vector<256x32xf32>
    %c0_11 = arith.constant 0 : index
    %c0_12 = arith.constant 0 : index
    %c0_13 = arith.constant 0 : index
    %12 = vector.load %arg5[%c0_11, %c0_12, %c0_13] : memref<1x256x32xf32, #tpu.memory_space<vmem>>, vector<1x256x32xf32>
    %13 = vector.shape_cast %12 : vector<1x256x32xf32> to vector<256x32xf32>
    %14 = vector.shape_cast %11 : vector<256x32xf32> to vector<1x256x32xf32>
    tpu.vector_store %arg5[%c0_11, %c0_12, %c0_13], %14 {strides = array<i32>} : memref<1x256x32xf32, #tpu.memory_space<vmem>>, vector<1x256x32xf32>,
    return
  }
  func.func @transform_0(%arg0: i32) -> (i32, i32, i32) {
    %c0_i32 = arith.constant 0 : i32
    %c0_i32_0 = arith.constant 0 : i32
    %c0_i32_1 = arith.constant 0 : i32
    return %arg0, %c0_i32, %c0_i32_0 : i32, i32, i32
  }
  func.func @transform_1(%arg0: i32) -> (i32, i32, i32) {
    %c0_i32 = arith.constant 0 : i32
    %c0_i32_0 = arith.constant 0 : i32
    %c0_i32_1 = arith.constant 0 : i32
    return %arg0, %c0_i32, %c0_i32_0 : i32, i32, i32
  }
  func.func @transform_2(%arg0: i32) -> (i32, i32) {
    %c0_i32 = arith.constant 0 : i32
    %c0_i32_0 = arith.constant 0 : i32
    %c0_i32_1 = arith.constant 0 : i32
    return %c0_i32, %c0_i32_0 : i32, i32
  }
  func.func @transform_3(%arg0: i32) -> (i32, i32) {
    %c0_i32 = arith.constant 0 : i32
    %c0_i32_0 = arith.constant 0 : i32
    %c0_i32_1 = arith.constant 0 : i32
    return %c0_i32, %c0_i32_0 : i32, i32
  }
  func.func @transform_4(%arg0: i32) -> (i32, i32, i32) {
    %c0_i32 = arith.constant 0 : i32
    %c0_i32_0 = arith.constant 0 : i32
    %c0_i32_1 = arith.constant 0 : i32
    return %arg0, %c0_i32, %c0_i32_0 : i32, i32, i32
  }
}

</mosaic_0001>

<bundles_post_ra>
// kernel: tpu_custom_call.1
= control target key start
LH: loop header
LB: loop body
LE: loop exit
PB: predicated region body
PF: predicated region fallthrough
CT: control target
= control target key end

     0   :  { %9 = vsyncpa [#allocation3], 0  ;;  %s1800_s0 = inlined_call_operand.hbm [shape: f32[2,256,256], index: 0, kind: input, shape index: {}]   ;;  %s1801_s1 = inlined_call_operand.vmem [shape: f32[2,256,16], index: 1, kind: input, shape index: {}]   ;;  %s1802_s2 = inlined_call_operand.vmem [shape: f32[16,32], index: 2, kind: input, shape index: {}]   ;;  %s1803_s3 = inlined_call_operand.vmem [shape: f32[1,32], index: 3, kind: input, shape index: {}]   ;;  %s1804_s4 = inlined_call_operand.vmem [shape: f32[2,256,32], index: 4, kind: output, shape index: {}]  }
   0x1   :  { %11 = vsyncpa [#allocation3 + $0x1], 0  ;;  %s1391_s15 = smov 0   ;;  %s1393_s16 = smov 0  }
   0x2   :  { %s1395_s17 = smov 0   ;;  %s1397_s18 = smov 0  }
   0x3 LB: > { %s1410_s19 = sadd.s32 4294967295, %s1360_s18   ;;  %s1413_s20 = sadd.s32 1, %s1360_s18   ;;  %s1360_s18 = sphi %s1397_s18, %s1811_s18   ;;  %s1356_s17 = sphi %s1395_s17, %s1810_s17   ;;  %s1352_s16 = sphi %s1393_s16, %s1809_s16   ;;  %s1348_s15 = sphi %s1391_s15, %s1808_s15  }
   0x4   : > { %s21_s21 = ssub.s32 %s1360_s18, %s1413_s20  ;;  %s24_s22 = sadd.s32 1, %s1356_s17 }
   0x5   : > { %p22_p0 = scmp.eq.s32.totalorder %s21_s21, 0  ;;  %p31_p1 = scmp.ne.s32.totalorder %s1356_s17, %s1352_s16 }
   0x6   : > { %p32_p2 = scmp.eq.s32.totalorder %s1360_s18, 0  ;;  %p37_p3 = scmp.ne.s32.totalorder %s1352_s16, %s1348_s15 }
   0x7   : > { %s1423_s23 = scalar_select %p22_p0, %s1356_s17, %s24_s22  }
   0x8   : > { %p33_p4 = por %p32_p2, %p31_p1  ;;  %p38_p5 = scmp.eq.s32.totalorder %s1410_s19, 0 }
   0x9   : > { %p1260_p6 = scmp.lt.s32.totalorder %s1360_s18, 2  ;;  %s161_s25 = sand.u32 1, %s1356_s17  }
   0xa   : > { %p1427_p7 = por %p38_p5, %p37_p3  ;;  %s1037_s26 = sshll.u32 %s161_s25, 9 }
   0xb   : > { %s1081_s27 = sshll.u32 %s1360_s18, 13  ;;  %s165_s5 = scalar_lea.vmem [#allocation2], %s1037_s26 }
   0xc   : > { %s1436_s30 = scalar_lea.hbm %s1800_s0, %s1081_s27  ;;  %s172_s6 = sshll.u32 %s165_s5, 4  ;;  %s1438_s6 = int_to_ptr.vmem [resolvable:$true] %s172_s6 }
   0xd   : > { %p1440_p8 = pnand %p1260_p6, %p33_p4  ;;  %s1445_s8 = scalar_lea.sflag [#allocation3], %s161_s25 }
   0xe   : > { %s1296_s9 = scalar_lea.hbm %s1436_s30, 8192  ;;  %s1301_s12 = scalar_lea.hbm %s1800_s0, 16384 }
   0xf   : > { %p1297_p10 = scmp.ne.s32.totalorder %s1436_s30, %s1296_s9  ;;  %p1298_p11 = pneg %p1440_p8 }
  0x10   : > { %p1302_p0 = scmp.lt.u32.totalorder %s1436_s30, %s1800_s0  ;;  %p1303_p1 = scmp.lt.u32.totalorder %s1301_s12, %s1296_s9 }
  0x11   : > { %p1299_p12 = pnand %p1298_p11, %p1297_p10  ;;  %p1305_p3 = scmp.lt.u32.totalorder %s1296_s9, %s1436_s30 }
  0x12   : > { %p1304_p2 = por %p1303_p1, %p1302_p0 }
  0x13   : > { %p1300_p13 = pneg %p1299_p12 }
  0x14   : > { %p1306_p4 = por %p1305_p3, %p1304_p2 }
  0x16   : > { %p1307_p5 = pnand %p1306_p4, %p1300_p13 }
  0x18   : > { %1310 = shalt.err (!%p1307_p5)
}
  0x19   : > { %s1311_s15 = scalar_lea.vmem %s1438_s6, 8192  ;;  %s1362_s21 = smov [#allocation2]  }
  0x1a   : > { %p1312_p6 = scmp.ne.s32.totalorder %s1438_s6, %s1311_s15  ;;  %s1316_s22 = sshll.u32 %s1362_s21, 4  ;;  %s1317_s22 = int_to_ptr.vmem [resolvable:$false] %s1316_s22 }
  0x1b   : > { %s1318_s25 = scalar_lea.vmem %s1317_s22, 16384  ;;  %p1319_p9 = scmp.lt.s32.totalorder %s1438_s6, %s1317_s22 }
  0x1c   : > { %p1314_p10 = pnand %p1312_p6, %p1298_p11  ;;  %p1320_p0 = scmp.lt.s32.totalorder %s1318_s25, %s1311_s15 }
  0x1e   : > { %p1315_p12 = pneg %p1314_p10  ;;  %p1321_p1 = por %p1320_p0, %p1319_p9 }
  0x20   : > { %p1322_p2 = pnand %p1321_p1, %p1315_p12 }
  0x22   : > { %1325 = shalt.err (!%p1322_p2)
}
  0x23   : > { %s1363_s26 = smov 256   ;;  %s1364_s27 = smov 16  }
  0x24   : > { %1259 = dma.hbm_to_vmem [thread:$0]  (!%p1440_p8), %s1436_s30, 8192, %s1438_s6, %s1445_s8, %s1363_s26, %s1363_s26, %s1364_s27  }
  0x25   : > { %p188_p11 = scmp.lt.s32.totalorder %s1360_s18, 3  ;;  %p1807_p13 = scmp.ge.s32.totalorder %s1360_s18, 1 }
  0x27   : > { %p189_p3 = pnand %p1807_p13, %p188_p11 }
  0x28   : > { %s194_s28 = sand.u32 (!%p189_p3), 1, %s1352_s16  }
  0x29   : > { %192 = sbr.rel (%p189_p3) target bundleno = 658 (0x292), region = 36  ;;  %s1041_s29 = sshll.u32 (!%p189_p3), %s194_s28, 9 }
  0x2a   : > { %s195_s5 = scalar_lea.sflag (!%p189_p3), [#allocation3], %s194_s28  ;;  %s1477_s9 = scalar_lea.vmem (!%p189_p3), [#allocation2], %s1041_s29 }
  0x30   : > { %1343 = dma.done.wait (%p1427_p7), %s195_s5, 8192  }
  0x31   : > { %1345 = vsyncadd (%p1427_p7), %s195_s5, 4294959104  ;;  %p228_p9 = scmp.lt.s32.totalorder %s1410_s19, 1  ;;  %v1365_v0 = vmov 0.0|0.0   ;;  %v239_v12 = vld [vmem:[%s1477_s9 + $0x8] sm:$0xff]  ;;  %v238_v51 = vld [vmem:[%s1477_s9] sm:$0xff]  ;;  %vm568_vm0 = vcmask 130048  }
  0x32   : > { %1170 = vmatprep.subr.bf16.mxu0 %v1365_v0  ;;  %1222 = vmatprep.subr.bf16.mxu1 %v1365_v0  ;;  %v287_v25 = vld [vmem:[%s1477_s9 + $0x188] sm:$0xff]  ;;  %v241_v52 = vld [vmem:[%s1477_s9 + $0x18] sm:$0xff]  ;;  %v286_v53 = vld [vmem:[%s1477_s9 + $0x180] sm:$0xff]  ;;  %vm922_vm1 = vcmask 261120  }
  0x33   : > { %s1813_s19 = smov (!%p228_p9, %s1410_s19), 1  ;;  %398 = vmatprep.mubr.f32.mxu0 %v239_v12  ;;  %518 = vmatprep.mubr.f32.mxu1 %v287_v25  ;;  %v289_v54 = vld [vmem:[%s1477_s9 + $0x198] sm:$0xff]  ;;  %v240_v55 = vld [vmem:[%s1477_s9 + $0x10] sm:$0xff]  ;;  %v243_v56 = vld [vmem:[%s1477_s9 + $0x28] sm:$0xff] }
  0x34   : > { %s1082_s18 = sshll.u32 %s1813_s19, 8  ;;  %v288_v57 = vld [vmem:[%s1477_s9 + $0x190] sm:$0xff]  ;;  %v291_v58 = vld [vmem:[%s1477_s9 + $0x1a8] sm:$0xff]  ;;  %v242_v59 = vld [vmem:[%s1477_s9 + $0x20] sm:$0xff] }
  0x35   : > { %s1495_s7 = scalar_lea.vmem %s1801_s1, %s1082_s18  ;;  %v245_v60 = vld [vmem:[%s1477_s9 + $0x38] sm:$0xff]  ;;  %v290_v61 = vld [vmem:[%s1477_s9 + $0x1a0] sm:$0xff]  ;;  %v244_v63 = vld [vmem:[%s1477_s9 + $0x30] sm:$0xff]  ;;  %s1690_s21 = scalar_lea.vmem %s1804_s4, %s1082_s18 }
  0x36   : > { %v302_v1 = vld [vmem:[%s1495_s7] sm:$0xff]  ;;  %v303_v2 = vld [vmem:[%s1495_s7 + $0x8] sm:$0xff]  ;;  %v304_v3 = vld [vmem:[%s1495_s7 + $0x10] sm:$0xff] }
  0x37   : > { %v1171_v4 = vpack.c.bf16 %v303_v2, %v302_v1  ;;  %v305_v5 = vld [vmem:[%s1495_s7 + $0x18] sm:$0xff]  ;;  %v306_v7 = vld [vmem:[%s1495_s7 + $0x20] sm:$0xff]  ;;  %v307_v8 = vld [vmem:[%s1495_s7 + $0x28] sm:$0xff] }
  0x38   : > { %v1174_v6 = vpack.c.bf16 %v305_v5, %v304_v3  ;;  %v1177_v9 = vpack.c.bf16 %v307_v8, %v306_v7  ;;  %v308_v10 = vld [vmem:[%s1495_s7 + $0x30] sm:$0xff]  ;;  %v309_v11 = vld [vmem:[%s1495_s7 + $0x38] sm:$0xff]  ;;  %v310_v14 = vld [vmem:[%s1495_s7 + $0x40] sm:$0xff] }
  0x39   : > { %1172 = vmatpush1.bf16.msra.mxu0 %v1171_v4  ;;  %1238 = vmatpush1.bf16.msra.mxu1 %v1171_v4  ;;  %v1180_v13 = vpack.c.bf16 %v309_v11, %v308_v10  ;;  %v311_v15 = vld [vmem:[%s1495_s7 + $0x48] sm:$0xff]  ;;  %v312_v17 = vld [vmem:[%s1495_s7 + $0x50] sm:$0xff]  ;;  %v313_v18 = vld [vmem:[%s1495_s7 + $0x58] sm:$0xff] }
  0x3a   : > { %1173 = vmatprep.subr.bf16.mxu0 %v1365_v0  ;;  %1223 = vmatprep.subr.bf16.mxu1 %v1365_v0  ;;  %v1183_v16 = vpack.c.bf16 %v311_v15, %v310_v14  ;;  %v1186_v19 = vpack.c.bf16 %v313_v18, %v312_v17  ;;  %v314_v20 = vld [vmem:[%s1495_s7 + $0x60] sm:$0xff]  ;;  %v315_v21 = vld [vmem:[%s1495_s7 + $0x68] sm:$0xff]  ;;  %v316_v23 = vld [vmem:[%s1495_s7 + $0x70] sm:$0xff] }
  0x3b   : > { %v1189_v22 = vpack.c.bf16 %v315_v21, %v314_v20  ;;  %v317_v24 = vld [vmem:[%s1495_s7 + $0x78] sm:$0xff]  ;;  %v318_v27 = vld [vmem:[%s1495_s7 + $0x80] sm:$0xff]  ;;  %v319_v28 = vld [vmem:[%s1495_s7 + $0x88] sm:$0xff] }
  0x3c   : > { %v1192_v26 = vpack.c.bf16 %v317_v24, %v316_v23  ;;  %v1195_v29 = vpack.c.bf16 %v319_v28, %v318_v27  ;;  %v320_v30 = vld [vmem:[%s1495_s7 + $0x90] sm:$0xff]  ;;  %v321_v31 = vld [vmem:[%s1495_s7 + $0x98] sm:$0xff]  ;;  %v322_v33 = vld [vmem:[%s1495_s7 + $0xa0] sm:$0xff] }
  0x3d   : > { %1175 = vmatpush1.bf16.msra.mxu0 %v1174_v6  ;;  %1239 = vmatpush1.bf16.msra.mxu1 %v1174_v6  ;;  %v1198_v32 = vpack.c.bf16 %v321_v31, %v320_v30  ;;  %v323_v34 = vld [vmem:[%s1495_s7 + $0xa8] sm:$0xff]  ;;  %v324_v36 = vld [vmem:[%s1495_s7 + $0xb0] sm:$0xff]  ;;  %v325_v37 = vld [vmem:[%s1495_s7 + $0xb8] sm:$0xff] }
  0x3e   : > { %1176 = vmatprep.subr.bf16.mxu0 %v1365_v0  ;;  %1224 = vmatprep.subr.bf16.mxu1 %v1365_v0  ;;  %v1201_v35 = vpack.c.bf16 %v323_v34, %v322_v33  ;;  %v1204_v38 = vpack.c.bf16 %v325_v37, %v324_v36  ;;  %v326_v39 = vld [vmem:[%s1495_s7 + $0xc0] sm:$0xff]  ;;  %v327_v40 = vld [vmem:[%s1495_s7 + $0xc8] sm:$0xff]  ;;  %v328_v42 = vld [vmem:[%s1495_s7 + $0xd0] sm:$0xff] }
  0x3f   : > { %v1207_v41 = vpack.c.bf16 %v327_v40, %v326_v39  ;;  %v329_v43 = vld [vmem:[%s1495_s7 + $0xd8] sm:$0xff]  ;;  %v330_v45 = vld [vmem:[%s1495_s7 + $0xe0] sm:$0xff]  ;;  %v331_v46 = vld [vmem:[%s1495_s7 + $0xe8] sm:$0xff] }
  0x40   : > { %v1210_v44 = vpack.c.bf16 %v329_v43, %v328_v42  ;;  %v1213_v47 = vpack.c.bf16 %v331_v46, %v330_v45  ;;  %v332_v48 = vld [vmem:[%s1495_s7 + $0xf0] sm:$0xff]  ;;  %v333_v49 = vld [vmem:[%s1495_s7 + $0xf8] sm:$0xff]  ;;  %v295_v2 = vld [vmem:[%s1477_s9 + $0x1c8] sm:$0xff] }
  0x41   : > { %1178 = vmatpush1.bf16.msra.mxu0 %v1177_v9  ;;  %1240 = vmatpush1.bf16.msra.mxu1 %v1177_v9  ;;  %v1216_v50 = vpack.c.bf16 %v333_v49, %v332_v48  ;;  %v293_v62 = vld [vmem:[%s1477_s9 + $0x1b8] sm:$0xff]  ;;  %v292_v1 = vld [vmem:[%s1477_s9 + $0x1b0] sm:$0xff]  ;;  %v246_v3 = vld [vmem:[%s1477_s9 + $0x40] sm:$0xff] }
  0x42   : > { %1179 = vmatprep.subr.bf16.mxu0 %v1365_v0  ;;  %1225 = vmatprep.subr.bf16.mxu1 %v1365_v0  ;;  %v249_v4 = vld [vmem:[%s1477_s9 + $0x58] sm:$0xff]  ;;  %v294_v5 = vld [vmem:[%s1477_s9 + $0x1c0] sm:$0xff]  ;;  %v248_v7 = vld [vmem:[%s1477_s9 + $0x50] sm:$0xff] }
  0x43   : > { %v297_v6 = vld [vmem:[%s1477_s9 + $0x1d8] sm:$0xff]  ;;  %v251_v8 = vld [vmem:[%s1477_s9 + $0x68] sm:$0xff]  ;;  %v296_v9 = vld [vmem:[%s1477_s9 + $0x1d0] sm:$0xff] }
  0x44   : > { %v299_v10 = vld [vmem:[%s1477_s9 + $0x1e8] sm:$0xff]  ;;  %v250_v11 = vld [vmem:[%s1477_s9 + $0x60] sm:$0xff]  ;;  %v253_v12 = vld [vmem:[%s1477_s9 + $0x78] sm:$0xff] }
  0x45   : > { %1181 = vmatpush1.bf16.msra.mxu0 %v1180_v13  ;;  %1241 = vmatpush1.bf16.msra.mxu1 %v1180_v13  ;;  %v298_v13 = vld [vmem:[%s1477_s9 + $0x1e0] sm:$0xff]  ;;  %v301_v14 = vld [vmem:[%s1477_s9 + $0x1f8] sm:$0xff]  ;;  %v252_v15 = vld [vmem:[%s1477_s9 + $0x70] sm:$0xff] }
  0x46   : > { %1182 = vmatprep.subr.bf16.mxu0 %v1365_v0  ;;  %1226 = vmatprep.subr.bf16.mxu1 %v1365_v0  ;;  %v300_v17 = vld [vmem:[%s1477_s9 + $0x1f0] sm:$0xff]  ;;  %v254_v18 = vld [vmem:[%s1477_s9 + $0x80] sm:$0xff]  ;;  %v259_v21 = vld [vmem:[%s1477_s9 + $0xa8] sm:$0xff] }
  0x47   : > { %v256_v20 = vld [vmem:[%s1477_s9 + $0x90] sm:$0xff]  ;;  %v261_v23 = vld [vmem:[%s1477_s9 + $0xb8] sm:$0xff]  ;;  %v263_v25 = vld [vmem:[%s1477_s9 + $0xc8] sm:$0xff] }
  0x48   : > { %v260_v24 = vld [vmem:[%s1477_s9 + $0xb0] sm:$0xff]  ;;  %v265_v27 = vld [vmem:[%s1477_s9 + $0xd8] sm:$0xff]  ;;  %v266_v30 = vld [vmem:[%s1477_s9 + $0xe0] sm:$0xff] }
  0x49   : > { %1184 = vmatpush1.bf16.msra.mxu0 %v1183_v16  ;;  %1242 = vmatpush1.bf16.msra.mxu1 %v1183_v16  ;;  %v255_v16 = vld [vmem:[%s1477_s9 + $0x88] sm:$0xff]  ;;  %v264_v28 = vld [vmem:[%s1477_s9 + $0xd0] sm:$0xff]  ;;  %v269_v31 = vld [vmem:[%s1477_s9 + $0xf8] sm:$0xff] }
  0x4a   : > { %1185 = vmatprep.subr.bf16.mxu0 %v1365_v0  ;;  %1227 = vmatprep.subr.bf16.mxu1 %v1365_v0  ;;  %v271_v33 = vld [vmem:[%s1477_s9 + $0x108] sm:$0xff]  ;;  %v270_v34 = vld [vmem:[%s1477_s9 + $0x100] sm:$0xff]  ;;  %v272_v36 = vld [vmem:[%s1477_s9 + $0x110] sm:$0xff] }
  0x4b   : > { %v275_v37 = vld [vmem:[%s1477_s9 + $0x128] sm:$0xff]  ;;  %v277_v39 = vld [vmem:[%s1477_s9 + $0x138] sm:$0xff]  ;;  %v276_v40 = vld [vmem:[%s1477_s9 + $0x130] sm:$0xff] }
  0x4c   : > { %v278_v42 = vld [vmem:[%s1477_s9 + $0x140] sm:$0xff]  ;;  %v281_v43 = vld [vmem:[%s1477_s9 + $0x158] sm:$0xff]  ;;  %v560_v46 = vld [vmem:[%s1802_s2 + $0x8] sm:$0xff] }
  0x4d   : > { %1187 = vmatpush1.bf16.msra.mxu0 %v1186_v19  ;;  %1243 = vmatpush1.bf16.msra.mxu1 %v1186_v19  ;;  %v257_v19 = vld [vmem:[%s1477_s9 + $0x98] sm:$0xff]  ;;  %v559_v45 = vld [vmem:[%s1802_s2] sm:$0xff] }
  0x4e   : > { %1188 = vmatprep.subr.bf16.mxu0 %v1365_v0  ;;  %1228 = vmatprep.subr.bf16.mxu1 %v1365_v0  ;;  %v1218_v48 = vpack.c.bf16 %v560_v46, %v559_v45  ;;  %v282_v49 = vld [vmem:[%s1477_s9 + $0x160] sm:$0xff] }
  0x51   : > { %1190 = vmatpush1.bf16.msra.mxu0 %v1189_v22  ;;  %1244 = vmatpush1.bf16.msra.mxu1 %v1189_v22  ;;  %v258_v22 = vld [vmem:[%s1477_s9 + $0xa0] sm:$0xff] }
  0x52   : > { %1191 = vmatprep.subr.bf16.mxu0 %v1365_v0  ;;  %1229 = vmatprep.subr.bf16.mxu1 %v1365_v0 }
  0x55   : > { %1193 = vmatpush1.bf16.msra.mxu0 %v1192_v26  ;;  %1245 = vmatpush1.bf16.msra.mxu1 %v1192_v26  ;;  %v262_v26 = vld [vmem:[%s1477_s9 + $0xc0] sm:$0xff] }
  0x56   : > { %1194 = vmatprep.subr.bf16.mxu0 %v1365_v0  ;;  %1230 = vmatprep.subr.bf16.mxu1 %v1365_v0 }
  0x59   : > { %1196 = vmatpush1.bf16.msra.mxu0 %v1195_v29  ;;  %1246 = vmatpush1.bf16.msra.mxu1 %v1195_v29  ;;  %v267_v29 = vld [vmem:[%s1477_s9 + $0xe8] sm:$0xff] }
  0x5a   : > { %1197 = vmatprep.subr.bf16.mxu0 %v1365_v0  ;;  %1231 = vmatprep.subr.bf16.mxu1 %v1365_v0 }
  0x5d   : > { %1199 = vmatpush1.bf16.msra.mxu0 %v1198_v32  ;;  %1247 = vmatpush1.bf16.msra.mxu1 %v1198_v32  ;;  %v268_v32 = vld [vmem:[%s1477_s9 + $0xf0] sm:$0xff] }
  0x5e   : > { %1200 = vmatprep.subr.bf16.mxu0 %v1365_v0  ;;  %1232 = vmatprep.subr.bf16.mxu1 %v1365_v0 }
  0x61   : > { %1202 = vmatpush1.bf16.msra.mxu0 %v1201_v35  ;;  %1248 = vmatpush1.bf16.msra.mxu1 %v1201_v35  ;;  %v273_v35 = vld [vmem:[%s1477_s9 + $0x118] sm:$0xff] }
  0x62   : > { %1203 = vmatprep.subr.bf16.mxu0 %v1365_v0  ;;  %1233 = vmatprep.subr.bf16.mxu1 %v1365_v0 }
  0x65   : > { %1205 = vmatpush1.bf16.msra.mxu0 %v1204_v38  ;;  %1249 = vmatpush1.bf16.msra.mxu1 %v1204_v38  ;;  %v274_v38 = vld [vmem:[%s1477_s9 + $0x120] sm:$0xff] }
  0x66   : > { %1206 = vmatprep.subr.bf16.mxu0 %v1365_v0  ;;  %1234 = vmatprep.subr.bf16.mxu1 %v1365_v0 }
  0x69   : > { %1208 = vmatpush1.bf16.msra.mxu0 %v1207_v41  ;;  %1250 = vmatpush1.bf16.msra.mxu1 %v1207_v41  ;;  %v279_v41 = vld [vmem:[%s1477_s9 + $0x148] sm:$0xff] }
  0x6a   : > { %1209 = vmatprep.subr.bf16.mxu0 %v1365_v0  ;;  %1235 = vmatprep.subr.bf16.mxu1 %v1365_v0 }
  0x6d   : > { %1211 = vmatpush1.bf16.msra.mxu0 %v1210_v44  ;;  %1251 = vmatpush1.bf16.msra.mxu1 %v1210_v44  ;;  %v280_v44 = vld [vmem:[%s1477_s9 + $0x150] sm:$0xff] }
  0x6e   : > { %1212 = vmatprep.subr.bf16.mxu0 %v1365_v0  ;;  %1236 = vmatprep.subr.bf16.mxu1 %v1365_v0 }
  0x71   : > { %1214 = vmatpush1.bf16.msra.mxu0 %v1213_v47  ;;  %1252 = vmatpush1.bf16.msra.mxu1 %v1213_v47  ;;  %v283_v47 = vld [vmem:[%s1477_s9 + $0x168] sm:$0xff] }
  0x72   : > { %1215 = vmatprep.subr.bf16.mxu0 %v1365_v0  ;;  %1237 = vmatprep.subr.bf16.mxu1 %v1365_v0  ;;  %v247_v0 = vld [vmem:[%s1477_s9 + $0x48] sm:$0xff] }
  0x75   : > { %1217 = vmatpush1.bf16.msra.mxu0 %v1216_v50  ;;  %1253 = vmatpush1.bf16.msra.mxu1 %v1216_v50  ;;  %v285_v50 = vld [vmem:[%s1477_s9 + $0x178] sm:$0xff] }
  0x76   : > { %1219 = vmatprep.subr.bf16.mxu1 %v1218_v48 }
  0x78   : > { %399 = vmatmul.mubr.f32.vlgmr.msra.gmra.mrb[0].mxu0 %v238_v51  ;;  %519 = vmatmul.mubr.f32.vlgmr.msra.gmra.mrb[0].mxu1 %v286_v53  ;;  %v284_v51 = vld [vmem:[%s1477_s9 + $0x170] sm:$0xff] }
  0x79   : > { %403 = vmatprep.mubr.f32.mxu0 %v241_v52  ;;  %523 = vmatprep.mubr.f32.mxu1 %v289_v54 }
  0x7a   : > { %1221 = vmatpush3.bf16.msra.mxu1 %v1218_v48 }
  0x7c   : > { %404 = vmatmul.mubr.f32.gmra.mrb[2].mxu0 %v240_v55  ;;  %524 = vmatmul.mubr.f32.gmra.mrb[2].mxu1 %v288_v57 }
  0x7d   : > { %408 = vmatprep.mubr.f32.mxu0 %v243_v56  ;;  %528 = vmatprep.mubr.f32.mxu1 %v291_v58 }
  0x80   : > { %409 = vmatmul.mubr.f32.gmra.mrb[4].mxu0 %v242_v59  ;;  %529 = vmatmul.mubr.f32.gmra.mrb[4].mxu1 %v290_v61 }
  0x81   : > { %413 = vmatprep.mubr.f32.mxu0 %v245_v60  ;;  %533 = vmatprep.mubr.f32.mxu1 %v293_v62 }
  0x84   : > { %414 = vmatmul.mubr.f32.gmra.mrb[6].mxu0 %v244_v63  ;;  %534 = vmatmul.mubr.f32.gmra.mrb[6].mxu1 %v292_v1 }
  0x85   : > { %418 = vmatprep.mubr.f32.mxu0 %v247_v0  ;;  %538 = vmatprep.mubr.f32.mxu1 %v295_v2 }
  0x88   : > { %419 = vmatmul.mubr.f32.gmra.mrb[8].mxu0 %v246_v3  ;;  %539 = vmatmul.mubr.f32.gmra.mrb[8].mxu1 %v294_v5 }
  0x89   : > { %423 = vmatprep.mubr.f32.mxu0 %v249_v4  ;;  %543 = vmatprep.mubr.f32.mxu1 %v297_v6 }
  0x8c   : > { %424 = vmatmul.mubr.f32.gmra.mrb[10].mxu0 %v248_v7  ;;  %544 = vmatmul.mubr.f32.gmra.mrb[10].mxu1 %v296_v9 }
  0x8d   : > { %428 = vmatprep.mubr.f32.mxu0 %v251_v8  ;;  %548 = vmatprep.mubr.f32.mxu1 %v299_v10 }
  0x90   : > { %429 = vmatmul.mubr.f32.gmra.mrb[12].mxu0 %v250_v11  ;;  %549 = vmatmul.mubr.f32.gmra.mrb[12].mxu1 %v298_v13 }
  0x91   : > { %433 = vmatprep.mubr.f32.mxu0 %v253_v12  ;;  %553 = vmatprep.mubr.f32.mxu1 %v301_v14 }
  0x94   : > { %434 = vmatmul.mubr.f32.gmra.mrb[14].mxu0 %v252_v15  ;;  %554 = vmatmul.mubr.f32.gmra.mrb[14].mxu1 %v300_v17 }
  0x95   : > { %438 = vmatprep.mubr.f32.mxu0 %v255_v16 }
  0x98   : > { %439 = vmatmul.mubr.f32.gmra.mrb[16].mxu0 %v254_v18 }
  0x99   : > { %443 = vmatprep.mubr.f32.mxu0 %v257_v19 }
  0x9c   : > { %444 = vmatmul.mubr.f32.gmra.mrb[18].mxu0 %v256_v20 }
  0x9d   : > { %448 = vmatprep.mubr.f32.mxu0 %v259_v21 }
  0xa0   : > { %449 = vmatmul.mubr.f32.gmra.mrb[20].mxu0 %v258_v22 }
  0xa1   : > { %453 = vmatprep.mubr.f32.mxu0 %v261_v23 }
  0xa4   : > { %454 = vmatmul.mubr.f32.gmra.mrb[22].mxu0 %v260_v24 }
  0xa5   : > { %458 = vmatprep.mubr.f32.mxu0 %v263_v25 }
  0xa8   : > { %459 = vmatmul.mubr.f32.gmra.mrb[24].mxu0 %v262_v26 }
  0xa9   : > { %463 = vmatprep.mubr.f32.mxu0 %v265_v27 }
  0xac   : > { %464 = vmatmul.mubr.f32.gmra.mrb[26].mxu0 %v264_v28 }
  0xad   : > { %468 = vmatprep.mubr.f32.mxu0 %v267_v29 }
  0xb0   : > { %469 = vmatmul.mubr.f32.gmra.mrb[28].mxu0 %v266_v30 }
  0xb1   : > { %473 = vmatprep.mubr.f32.mxu0 %v269_v31 }
  0xb4   : > { %474 = vmatmul.mubr.f32.gmra.mrb[30].mxu0 %v268_v32 }
  0xb5   : > { %478 = vmatprep.mubr.f32.mxu0 %v271_v33 }
  0xb8   : > { %479 = vmatmul.mubr.f32.gmra.mrb[32].mxu0 %v270_v34 }
  0xb9   : > { %483 = vmatprep.mubr.f32.mxu0 %v273_v35 }
  0xbc   : > { %484 = vmatmul.mubr.f32.gmra.mrb[34].mxu0 %v272_v36 }
  0xbd   : > { %488 = vmatprep.mubr.f32.mxu0 %v275_v37 }
  0xc0   : > { %489 = vmatmul.mubr.f32.gmra.mrb[36].mxu0 %v274_v38 }
  0xc1   : > { %493 = vmatprep.mubr.f32.mxu0 %v277_v39 }
  0xc4   : > { %494 = vmatmul.mubr.f32.gmra.mrb[38].mxu0 %v276_v40 }
  0xc5   : > { %498 = vmatprep.mubr.f32.mxu0 %v279_v41 }
  0xc8   : > { %499 = vmatmul.mubr.f32.gmra.mrb[40].mxu0 %v278_v42 }
  0xc9   : > { %503 = vmatprep.mubr.f32.mxu0 %v281_v43 }
  0xcc   : > { %504 = vmatmul.mubr.f32.gmra.mrb[42].mxu0 %v280_v44 }
  0xcd   : > { %508 = vmatprep.mubr.f32.mxu0 %v283_v47 }
  0xd0   : > { %509 = vmatmul.mubr.f32.gmra.mrb[44].mxu0 %v282_v49 }
  0xd1   : > { %513 = vmatprep.mubr.f32.mxu0 %v285_v50 }
  0xd4   : > { %514 = vmatmul.mubr.f32.gmra.mrb[46].mxu0 %v284_v51 }
 0x14b   : > { %v400_v52 = vpop.f32.mrb[0].mxu0  ;;  %v1630_v54 = vpop.f32.mrb[0].mxu1 }
 0x14c   : > { %v402_v53 = vpop.f32.mrb[1].mxu0  ;;  %1122 = vmatprep.mubr.msk.f32.mxu1 %vm568_vm0, %v400_v52  ;;  %v522_v55 = vpop.f32.mrb[1].mxu1  ;;  %v1682_v52 = vld [vmem:[%s1803_s3] ss:$0 sm:$0xff] }
 0x14f   : > { %v405_v56 = vpop.f32.mrb[2].mxu0  ;;  %v1633_v58 = vpop.f32.mrb[2].mxu1 }
 0x150   : > { %v407_v57 = vpop.f32.mrb[3].mxu0  ;;  %1123 = vmatmul.mubr.msk.f32.vlgmr.msra.gmra.mrb[16].mxu1 %vm568_vm0, %v405_v56  ;;  %v527_v59 = vpop.f32.mrb[3].mxu1 }
 0x153   : > { %v410_v60 = vpop.f32.mrb[4].mxu0  ;;  %v1636_v62 = vpop.f32.mrb[4].mxu1 }
 0x154   : > { %v412_v61 = vpop.f32.mrb[5].mxu0  ;;  %1125 = vmatprep.mubr.msk.f32.mxu1 %vm568_vm0, %v410_v60  ;;  %v532_v63 = vpop.f32.mrb[5].mxu1 }
 0x157   : > { %v415_v0 = vpop.f32.mrb[6].mxu0  ;;  %v1639_v2 = vpop.f32.mrb[6].mxu1 }
 0x158   : > { %v417_v1 = vpop.f32.mrb[7].mxu0  ;;  %1126 = vmatmul.mubr.msk.f32.gmra.mrb[18].mxu1 %vm568_vm0, %v415_v0  ;;  %v537_v3 = vpop.f32.mrb[7].mxu1 }
 0x15b   : > { %v420_v4 = vpop.f32.mrb[8].mxu0  ;;  %v1642_v6 = vpop.f32.mrb[8].mxu1 }
 0x15c   : > { %v422_v5 = vpop.f32.mrb[9].mxu0  ;;  %1128 = vmatprep.mubr.msk.f32.mxu1 %vm568_vm0, %v420_v4  ;;  %v542_v7 = vpop.f32.mrb[9].mxu1 }
 0x15f   : > { %v425_v8 = vpop.f32.mrb[10].mxu0  ;;  %v1645_v10 = vpop.f32.mrb[10].mxu1 }
 0x160   : > { %v427_v9 = vpop.f32.mrb[11].mxu0  ;;  %1129 = vmatmul.mubr.msk.f32.gmra.mrb[20].mxu1 %vm568_vm0, %v425_v8  ;;  %v547_v11 = vpop.f32.mrb[11].mxu1 }
 0x163   : > { %v430_v12 = vpop.f32.mrb[12].mxu0  ;;  %v550_v14 = vpop.f32.mrb[12].mxu1 }
 0x164   : > { %v432_v13 = vpop.f32.mrb[13].mxu0  ;;  %1131 = vmatprep.mubr.msk.f32.mxu1 %vm568_vm0, %v430_v12  ;;  %v552_v15 = vpop.f32.mrb[13].mxu1 }
 0x167   : > { %v435_v16 = vpop.f32.mrb[14].mxu0  ;;  %v555_v18 = vpop.f32.mrb[14].mxu1 }
 0x168   : > { %v437_v17 = vpop.f32.mrb[15].mxu0  ;;  %1132 = vmatmul.mubr.msk.f32.gmra.mrb[22].mxu1 %vm568_vm0, %v435_v16  ;;  %v557_v19 = vpop.f32.mrb[15].mxu1 }
 0x16b   : > { %v440_v20 = vpop.f32.mrb[16].mxu0 }
 0x16c   : > { %v442_v21 = vpop.f32.mrb[17].mxu0  ;;  %1134 = vmatprep.mubr.msk.f32.mxu1 %vm568_vm0, %v440_v20 }
 0x16f   : > { %v445_v22 = vpop.f32.mrb[18].mxu0 }
 0x170   : > { %v447_v23 = vpop.f32.mrb[19].mxu0  ;;  %1135 = vmatmul.mubr.msk.f32.gmra.mrb[24].mxu1 %vm568_vm0, %v445_v22 }
 0x173   : > { %v450_v24 = vpop.f32.mrb[20].mxu0 }
 0x174   : > { %v452_v25 = vpop.f32.mrb[21].mxu0  ;;  %1137 = vmatprep.mubr.msk.f32.mxu1 %vm568_vm0, %v450_v24 }
 0x177   : > { %v455_v26 = vpop.f32.mrb[22].mxu0 }
 0x178   : > { %v457_v27 = vpop.f32.mrb[23].mxu0  ;;  %1138 = vmatmul.mubr.msk.f32.gmra.mrb[26].mxu1 %vm568_vm0, %v455_v26 }
 0x17b   : > { %v460_v28 = vpop.f32.mrb[24].mxu0 }
 0x17c   : > { %v462_v29 = vpop.f32.mrb[25].mxu0  ;;  %1140 = vmatprep.mubr.msk.f32.mxu1 %vm568_vm0, %v460_v28 }
 0x17f   : > { %v465_v30 = vpop.f32.mrb[26].mxu0 }
 0x180   : > { %v467_v31 = vpop.f32.mrb[27].mxu0  ;;  %1141 = vmatmul.mubr.msk.f32.gmra.mrb[28].mxu1 %vm568_vm0, %v465_v30 }
 0x183   : > { %v470_v32 = vpop.f32.mrb[28].mxu0 }
 0x184   : > { %v472_v33 = vpop.f32.mrb[29].mxu0  ;;  %1143 = vmatprep.mubr.msk.f32.mxu1 %vm568_vm0, %v470_v32 }
 0x187   : > { %v475_v34 = vpop.f32.mrb[30].mxu0 }
 0x188   : > { %v477_v35 = vpop.f32.mrb[31].mxu0  ;;  %1144 = vmatmul.mubr.msk.f32.gmra.mrb[30].mxu1 %vm568_vm0, %v475_v34 }
 0x18b   : > { %v480_v36 = vpop.f32.mrb[32].mxu0 }
 0x18c   : > { %v482_v37 = vpop.f32.mrb[33].mxu0  ;;  %1146 = vmatprep.mubr.msk.f32.mxu1 %vm568_vm0, %v480_v36 }
 0x18f   : > { %v485_v38 = vpop.f32.mrb[34].mxu0 }
 0x190   : > { %v487_v39 = vpop.f32.mrb[35].mxu0  ;;  %1147 = vmatmul.mubr.msk.f32.gmra.mrb[32].mxu1 %vm568_vm0, %v485_v38 }
 0x193   : > { %v490_v40 = vpop.f32.mrb[36].mxu0 }
 0x194   : > { %v492_v41 = vpop.f32.mrb[37].mxu0  ;;  %1149 = vmatprep.mubr.msk.f32.mxu1 %vm568_vm0, %v490_v40 }
 0x197   : > { %v495_v42 = vpop.f32.mrb[38].mxu0 }
 0x198   : > { %v497_v43 = vpop.f32.mrb[39].mxu0  ;;  %1150 = vmatmul.mubr.msk.f32.gmra.mrb[34].mxu1 %vm568_vm0, %v495_v42 }
 0x19b   : > { %v500_v44 = vpop.f32.mrb[40].mxu0 }
 0x19c   : > { %v502_v45 = vpop.f32.mrb[41].mxu0  ;;  %1152 = vmatprep.mubr.msk.f32.mxu1 %vm568_vm0, %v500_v44 }
 0x19f   : > { %v505_v46 = vpop.f32.mrb[42].mxu0 }
 0x1a0   : > { %v507_v47 = vpop.f32.mrb[43].mxu0  ;;  %1153 = vmatmul.mubr.msk.f32.gmra.mrb[36].mxu1 %vm568_vm0, %v505_v46 }
 0x1a3   : > { %v510_v48 = vpop.f32.mrb[44].mxu0 }
 0x1a4   : > { %v512_v49 = vpop.f32.mrb[45].mxu0  ;;  %1155 = vmatprep.mubr.msk.f32.mxu1 %vm568_vm0, %v510_v48 }
 0x1a7   : > { %v515_v50 = vpop.f32.mrb[46].mxu0 }
 0x1a8   : > { %v517_v51 = vpop.f32.mrb[47].mxu0  ;;  %1156 = vmatmul.mubr.msk.f32.gmra.mrb[38].mxu1 %vm568_vm0, %v515_v50 }
 0x1a9   : > { %1158 = vmatprep.mubr.msk.f32.mxu1 %vm568_vm0, %v1630_v54 }
 0x1ac   : > { %1159 = vmatmul.mubr.msk.f32.gmra.mrb[40].mxu1 %vm568_vm0, %v1633_v58 }
 0x1ad   : > { %1161 = vmatprep.mubr.msk.f32.mxu1 %vm568_vm0, %v1636_v62 }
 0x1b0   : > { %1162 = vmatmul.mubr.msk.f32.gmra.mrb[42].mxu1 %vm568_vm0, %v1639_v2 }
 0x1b1   : > { %1164 = vmatprep.mubr.msk.f32.mxu1 %vm568_vm0, %v1642_v6 }
 0x1b4   : > { %1165 = vmatmul.mubr.msk.f32.gmra.mrb[44].mxu1 %vm568_vm0, %v1645_v10 }
 0x1b5   : > { %1167 = vmatprep.mubr.msk.f32.mxu1 %vm568_vm0, %v550_v14 }
 0x1b8   : > { %1168 = vmatmul.mubr.msk.f32.gmra.mrb[46].mxu1 %vm568_vm0, %v555_v18 }
 0x223   : > { %v1124_v53 = vpop.f32.mrb[16].mxu1 }
 0x224   : > { %v737_v54 = vadd.f32 %v1124_v53, %v1682_v52  ;;  %v731_v55 = vpop.f32.mrb[17].mxu1 }
 0x225   : > { %v732_v56 = vadd.f32 %v1682_v52, %v731_v55 }
 0x226   : > { %v891_v57 = vmax.f32 %v737_v54, 0.0 }
 0x227   : > { %v890_v58 = vmax.f32 %v732_v56, 0.0 }
 0x228   : > { %924 = vst.msk [vmem:[%s1690_s21 + $0x8] sm:$0xff] %vm922_vm1, %v891_v57 }
 0x229   : > { %923 = vst.msk [vmem:[%s1690_s21] sm:$0xff] %vm922_vm1, %v890_v58 }
 0x22b   : > { %v1127_v59 = vpop.f32.mrb[18].mxu1 }
 0x22c   : > { %v747_v60 = vadd.f32 %v1127_v59, %v1682_v52  ;;  %v741_v61 = vpop.f32.mrb[19].mxu1 }
 0x22d   : > { %v742_v62 = vadd.f32 %v1682_v52, %v741_v61 }
 0x22e   : > { %v893_v63 = vmax.f32 %v747_v60, 0.0 }
 0x22f   : > { %v892_v0 = vmax.f32 %v742_v62, 0.0 }
 0x230   : > { %926 = vst.msk [vmem:[%s1690_s21 + $0x18] sm:$0xff] %vm922_vm1, %v893_v63 }
 0x231   : > { %925 = vst.msk [vmem:[%s1690_s21 + $0x10] sm:$0xff] %vm922_vm1, %v892_v0 }
 0x233   : > { %v1130_v1 = vpop.f32.mrb[20].mxu1 }
 0x234   : > { %v757_v2 = vadd.f32 %v1130_v1, %v1682_v52  ;;  %v751_v3 = vpop.f32.mrb[21].mxu1 }
 0x235   : > { %v752_v4 = vadd.f32 %v1682_v52, %v751_v3 }
 0x236   : > { %v895_v5 = vmax.f32 %v757_v2, 0.0 }
 0x237   : > { %v894_v6 = vmax.f32 %v752_v4, 0.0 }
 0x238   : > { %928 = vst.msk [vmem:[%s1690_s21 + $0x28] sm:$0xff] %vm922_vm1, %v895_v5 }
 0x239   : > { %927 = vst.msk [vmem:[%s1690_s21 + $0x20] sm:$0xff] %vm922_vm1, %v894_v6 }
 0x23b   : > { %v1133_v7 = vpop.f32.mrb[22].mxu1 }
 0x23c   : > { %v767_v8 = vadd.f32 %v1133_v7, %v1682_v52  ;;  %v761_v9 = vpop.f32.mrb[23].mxu1 }
 0x23d   : > { %v762_v10 = vadd.f32 %v1682_v52, %v761_v9 }
 0x23e   : > { %v897_v11 = vmax.f32 %v767_v8, 0.0 }
 0x23f   : > { %v896_v12 = vmax.f32 %v762_v10, 0.0 }
 0x240   : > { %930 = vst.msk [vmem:[%s1690_s21 + $0x38] sm:$0xff] %vm922_vm1, %v897_v11 }
 0x241   : > { %929 = vst.msk [vmem:[%s1690_s21 + $0x30] sm:$0xff] %vm922_vm1, %v896_v12 }
 0x243   : > { %v1136_v13 = vpop.f32.mrb[24].mxu1 }
 0x244   : > { %v777_v14 = vadd.f32 %v1136_v13, %v1682_v52  ;;  %v771_v15 = vpop.f32.mrb[25].mxu1 }
 0x245   : > { %v772_v16 = vadd.f32 %v1682_v52, %v771_v15 }
 0x246   : > { %v899_v17 = vmax.f32 %v777_v14, 0.0 }
 0x247   : > { %v898_v18 = vmax.f32 %v772_v16, 0.0 }
 0x248   : > { %932 = vst.msk [vmem:[%s1690_s21 + $0x48] sm:$0xff] %vm922_vm1, %v899_v17 }
 0x249   : > { %931 = vst.msk [vmem:[%s1690_s21 + $0x40] sm:$0xff] %vm922_vm1, %v898_v18 }
 0x24b   : > { %v1139_v19 = vpop.f32.mrb[26].mxu1 }
 0x24c   : > { %v787_v20 = vadd.f32 %v1139_v19, %v1682_v52  ;;  %v781_v21 = vpop.f32.mrb[27].mxu1 }
 0x24d   : > { %v782_v22 = vadd.f32 %v1682_v52, %v781_v21 }
 0x24e   : > { %v901_v23 = vmax.f32 %v787_v20, 0.0 }
 0x24f   : > { %v900_v24 = vmax.f32 %v782_v22, 0.0 }
 0x250   : > { %934 = vst.msk [vmem:[%s1690_s21 + $0x58] sm:$0xff] %vm922_vm1, %v901_v23 }
 0x251   : > { %933 = vst.msk [vmem:[%s1690_s21 + $0x50] sm:$0xff] %vm922_vm1, %v900_v24 }
 0x253   : > { %v1142_v25 = vpop.f32.mrb[28].mxu1 }
 0x254   : > { %v797_v26 = vadd.f32 %v1142_v25, %v1682_v52  ;;  %v791_v27 = vpop.f32.mrb[29].mxu1 }
 0x255   : > { %v792_v28 = vadd.f32 %v1682_v52, %v791_v27 }
 0x256   : > { %v903_v29 = vmax.f32 %v797_v26, 0.0 }
 0x257   : > { %v902_v30 = vmax.f32 %v792_v28, 0.0 }
 0x258   : > { %936 = vst.msk [vmem:[%s1690_s21 + $0x68] sm:$0xff] %vm922_vm1, %v903_v29 }
 0x259   : > { %935 = vst.msk [vmem:[%s1690_s21 + $0x60] sm:$0xff] %vm922_vm1, %v902_v30 }
 0x25b   : > { %v1145_v31 = vpop.f32.mrb[30].mxu1 }
 0x25c   : > { %v807_v32 = vadd.f32 %v1145_v31, %v1682_v52  ;;  %v801_v33 = vpop.f32.mrb[31].mxu1 }
 0x25d   : > { %v802_v34 = vadd.f32 %v1682_v52, %v801_v33 }
 0x25e   : > { %v905_v35 = vmax.f32 %v807_v32, 0.0 }
 0x25f   : > { %v904_v36 = vmax.f32 %v802_v34, 0.0 }
 0x260   : > { %938 = vst.msk [vmem:[%s1690_s21 + $0x78] sm:$0xff] %vm922_vm1, %v905_v35 }
 0x261   : > { %937 = vst.msk [vmem:[%s1690_s21 + $0x70] sm:$0xff] %vm922_vm1, %v904_v36 }
 0x263   : > { %v1148_v37 = vpop.f32.mrb[32].mxu1 }
 0x264   : > { %v817_v38 = vadd.f32 %v1148_v37, %v1682_v52  ;;  %v811_v39 = vpop.f32.mrb[33].mxu1 }
 0x265   : > { %v812_v40 = vadd.f32 %v1682_v52, %v811_v39 }
 0x266   : > { %v907_v41 = vmax.f32 %v817_v38, 0.0 }
 0x267   : > { %v906_v42 = vmax.f32 %v812_v40, 0.0 }
 0x268   : > { %940 = vst.msk [vmem:[%s1690_s21 + $0x88] sm:$0xff] %vm922_vm1, %v907_v41 }
 0x269   : > { %939 = vst.msk [vmem:[%s1690_s21 + $0x80] sm:$0xff] %vm922_vm1, %v906_v42 }
 0x26b   : > { %v1151_v43 = vpop.f32.mrb[34].mxu1 }
 0x26c   : > { %v827_v44 = vadd.f32 %v1151_v43, %v1682_v52  ;;  %v821_v45 = vpop.f32.mrb[35].mxu1 }
 0x26d   : > { %v822_v46 = vadd.f32 %v1682_v52, %v821_v45 }
 0x26e   : > { %v909_v47 = vmax.f32 %v827_v44, 0.0 }
 0x26f   : > { %v908_v48 = vmax.f32 %v822_v46, 0.0 }
 0x270   : > { %942 = vst.msk [vmem:[%s1690_s21 + $0x98] sm:$0xff] %vm922_vm1, %v909_v47 }
 0x271   : > { %941 = vst.msk [vmem:[%s1690_s21 + $0x90] sm:$0xff] %vm922_vm1, %v908_v48 }
 0x273   : > { %v1154_v49 = vpop.f32.mrb[36].mxu1 }
 0x274   : > { %v837_v50 = vadd.f32 %v1154_v49, %v1682_v52  ;;  %v831_v51 = vpop.f32.mrb[37].mxu1 }
 0x275   : > { %v832_v53 = vadd.f32 %v1682_v52, %v831_v51 }
 0x276   : > { %v911_v54 = vmax.f32 %v837_v50, 0.0 }
 0x277   : > { %v910_v55 = vmax.f32 %v832_v53, 0.0 }
 0x278   : > { %944 = vst.msk [vmem:[%s1690_s21 + $0xa8] sm:$0xff] %vm922_vm1, %v911_v54 }
 0x279   : > { %943 = vst.msk [vmem:[%s1690_s21 + $0xa0] sm:$0xff] %vm922_vm1, %v910_v55 }
 0x27b   : > { %v1157_v56 = vpop.f32.mrb[38].mxu1 }
 0x27c   : > { %v847_v57 = vadd.f32 %v1157_v56, %v1682_v52  ;;  %v841_v58 = vpop.f32.mrb[39].mxu1 }
 0x27d   : > { %v842_v59 = vadd.f32 %v1682_v52, %v841_v58 }
 0x27e   : > { %v913_v60 = vmax.f32 %v847_v57, 0.0 }
 0x27f   : > { %v912_v61 = vmax.f32 %v842_v59, 0.0  ;;  %v1160_v62 = vpop.f32.mrb[40].mxu1 }
 0x280   : > { %946 = vst.msk [vmem:[%s1690_s21 + $0xb8] sm:$0xff] %vm922_vm1, %v913_v60  ;;  %v857_v63 = vadd.f32 %v1160_v62, %v1682_v52  ;;  %v851_v0 = vpop.f32.mrb[41].mxu1 }
 0x281   : > { %945 = vst.msk [vmem:[%s1690_s21 + $0xb0] sm:$0xff] %vm922_vm1, %v912_v61  ;;  %v852_v1 = vadd.f32 %v1682_v52, %v851_v0 }
 0x282   : > { %v915_v2 = vmax.f32 %v857_v63, 0.0 }
 0x283   : > { %v914_v3 = vmax.f32 %v852_v1, 0.0  ;;  %v1163_v4 = vpop.f32.mrb[42].mxu1 }
 0x284   : > { %948 = vst.msk [vmem:[%s1690_s21 + $0xc8] sm:$0xff] %vm922_vm1, %v915_v2  ;;  %v867_v5 = vadd.f32 %v1163_v4, %v1682_v52  ;;  %v861_v6 = vpop.f32.mrb[43].mxu1 }
 0x285   : > { %947 = vst.msk [vmem:[%s1690_s21 + $0xc0] sm:$0xff] %vm922_vm1, %v914_v3  ;;  %v862_v7 = vadd.f32 %v1682_v52, %v861_v6 }
 0x286   : > { %v917_v8 = vmax.f32 %v867_v5, 0.0 }
 0x287   : > { %v916_v9 = vmax.f32 %v862_v7, 0.0  ;;  %v1166_v10 = vpop.f32.mrb[44].mxu1 }
 0x288   : > { %950 = vst.msk [vmem:[%s1690_s21 + $0xd8] sm:$0xff] %vm922_vm1, %v917_v8  ;;  %v877_v11 = vadd.f32 %v1166_v10, %v1682_v52  ;;  %v871_v12 = vpop.f32.mrb[45].mxu1 }
 0x289   : > { %949 = vst.msk [vmem:[%s1690_s21 + $0xd0] sm:$0xff] %vm922_vm1, %v916_v9  ;;  %v872_v13 = vadd.f32 %v1682_v52, %v871_v12 }
 0x28a   : > { %v919_v14 = vmax.f32 %v877_v11, 0.0 }
 0x28b   : > { %v918_v15 = vmax.f32 %v872_v13, 0.0  ;;  %v1169_v16 = vpop.f32.mrb[46].mxu1 }
 0x28c   : > { %952 = vst.msk [vmem:[%s1690_s21 + $0xe8] sm:$0xff] %vm922_vm1, %v919_v14  ;;  %v887_v17 = vadd.f32 %v1169_v16, %v1682_v52  ;;  %v881_v18 = vpop.f32.mrb[47].mxu1 }
 0x28d   : > { %951 = vst.msk [vmem:[%s1690_s21 + $0xe0] sm:$0xff] %vm922_vm1, %v918_v15  ;;  %v882_v19 = vadd.f32 %v1682_v52, %v881_v18 }
 0x28e   : > { %v921_v20 = vmax.f32 %v887_v17, 0.0 }
 0x28f   : > { %v920_v21 = vmax.f32 %v882_v19, 0.0 }
 0x290   : > { %954 = vst.msk [vmem:[%s1690_s21 + $0xf8] sm:$0xff] %vm922_vm1, %v921_v20 }
 0x291   : > { %953 = vst.msk [vmem:[%s1690_s21 + $0xf0] sm:$0xff] %vm922_vm1, %v920_v21 }
 0x292 PF: > { %p14_p7 = scmp.ge.s32.totalorder %s1413_s20, 4   ;;  %s1808_s15 = smov %s1352_s16 }
 0x293   : > { %s1809_s16 = smov %s1356_s17  ;;  %s1810_s17 = smov %s1423_s23 }
 0x294   : > { %s1811_s18 = smov %s1413_s20  ;;  %16 = sbr.rel (!%p14_p7) target bundleno = 3 (0x3), region = 79 }
 0x29b   :  { %976 = vsyncpa [#allocation3], 1 }
 0x29c   :  { %978 = vsyncpa [#allocation3 + $0x1], 1 }

</bundles_post_ra>
